<compile_context>
chip_gen: v7x
topology: tpu7x:2x2x1
jax: 0.10.0
libtpu: 0.0.40
codegen_flags: <defaults>
</compile_context>

<pallas_src>
from math import ceil

import jax
import jax.numpy as jnp
from jax.experimental import pallas as pl
from jax.experimental.pallas import tpu as pltpu


def _pair(x):
    if isinstance(x, (tuple, list)):
        return tuple(x)
    return (x, x)


def _round_up(x, m):
    return ((x + m - 1) // m) * m


# ---------------------------------------------------------------------------
# Pallas kernel: tiled (im2col-patches @ flattened-weights), f32 accumulator,
# bias added once in the finalize step.
# ---------------------------------------------------------------------------
def _conv_matmul_kernel(p_ref, w_ref, b_ref, o_ref, acc_ref):
    # p_ref: (tm, tk) bf16 patches
    # w_ref: (tk, tn) bf16 flattened conv weights
    # b_ref: (1, tn)  f32 bias
    # o_ref: (tm, tn) output tile
    # acc_ref: (tm, tn) f32 accumulator scratch (resident across K axis)
    k = pl.program_id(2)

    @pl.when(k == 0)
    def _():
        acc_ref[...] = jnp.zeros_like(acc_ref)

    acc_ref[...] += jnp.dot(
        p_ref[...], w_ref[...], preferred_element_type=jnp.float32)

    @pl.when(k == pl.num_programs(2) - 1)
    def _():
        o_ref[...] = (acc_ref[...] + b_ref[...]).astype(o_ref.dtype)


def _pallas_conv_matmul(patches, w_flat, bias, out_dtype):
    M, K = patches.shape
    K2, Cout = w_flat.shape
    assert K == K2

    # Tile sizes: MXU-friendly (lane dim multiples of 128, sublane multiples
    # of 16 for bf16), capped at 256 so 2x double-buffered bf16 input tiles
    # + f32 accumulator + output tile stay well under the 32 MiB scoped VMEM
    # default on every generation (v7x has only 64 MiB physical VMEM).
    tm = min(256, _round_up(M, 16))
    tn = min(256, _round_up(Cout, 128))
    tk = min(256, _round_up(K, 128))

    M_p = _round_up(M, tm)
    N_p = _round_up(Cout, tn)
    K_p = _round_up(K, tk)

    # Zero-pad to tile multiples.  Padding Cout up to >=128 lanes makes the
    # output lane-dense (unmasked vst) and fills the MXU N dimension; zero
    # K / M padding does not change the math (sliced off below).
    p = jnp.pad(patches, ((0, M_p - M), (0, K_p - K)))
    w = jnp.pad(w_flat, ((0, K_p - K), (0, N_p - Cout)))
    b = jnp.pad(bias.reshape(1, Cout).astype(jnp.float32),
                ((0, 0), (0, N_p - Cout)))

    # bf16 operands on the MXU; accumulation stays f32 inside the kernel.
    p = p.astype(jnp.bfloat16)
    w = w.astype(jnp.bfloat16)

    grid = (M_p // tm, N_p // tn, K_p // tk)

    flops = 2 * M_p * K_p * N_p
    bytes_accessed = (p.size * 2 + w.size * 2 + b.size * 4
                      + M_p * N_p * jnp.dtype(out_dtype).itemsize)

    out = pl.pallas_call(
        _conv_matmul_kernel,
        out_shape=jax.ShapeDtypeStruct((M_p, N_p), out_dtype),
        grid_spec=pltpu.PrefetchScalarGridSpec(
            num_scalar_prefetch=0,
            grid=grid,
            in_specs=[
                pl.BlockSpec((tm, tk), lambda i, j, k: (i, k)),
                pl.BlockSpec((tk, tn), lambda i, j, k: (k, j)),
                pl.BlockSpec((1, tn), lambda i, j, k: (0, j)),
            ],
            out_specs=pl.BlockSpec((tm, tn), lambda i, j, k: (i, j)),
            scratch_shapes=[pltpu.VMEM((tm, tn), jnp.float32)],
        ),
        compiler_params=pltpu.CompilerParams(
            dimension_semantics=("parallel", "parallel", "arbitrary")),
        cost_estimate=pl.CostEstimate(
            flops=flops, transcendentals=0, bytes_accessed=bytes_accessed),
    )(p, w, b)

    return out[:M, :Cout]


# ---------------------------------------------------------------------------
# SamePaddingConv2d in JAX + Pallas
# ---------------------------------------------------------------------------
class SamePaddingConv2d:
    def __init__(self, in_spatial_shape, in_channels, out_channels,
                 kernel_size, stride, dilation=1,
                 enforce_in_spatial_shape=False, key=None):
        self.in_spatial_shape = _pair(in_spatial_shape)
        self.kernel_size = _pair(kernel_size)
        self.stride = _pair(stride)
        self.dilation = _pair(dilation)
        self.in_channels = in_channels
        self.out_channels = out_channels
        self.enforce_in_spatial_shape = enforce_in_spatial_shape

        ih, iw = self.in_spatial_shape
        kh, kw = self.kernel_size
        sh, sw = self.stride
        dh, dw = self.dilation

        oh = int(ceil(float(ih) / float(sh)))
        ow = int(ceil(float(iw) / float(sw)))
        pad_h = max((oh - 1) * sh + kh + (kh - 1) * (dh - 1) - ih, 0)
        pad_w = max((ow - 1) * sw + kw + (kw - 1) * (dw - 1) - iw, 0)
        self.pad_top = pad_h // 2
        self.pad_bottom = pad_h - self.pad_top
        self.pad_left = pad_w // 2
        self.pad_right = pad_w - self.pad_left
        self.out_spatial_shape = (oh, ow)

        # Deterministic parameter init (same shapes as nn.Conv2d).
        if key is None:
            key = jax.random.PRNGKey(0)
        k_w, k_b = jax.random.split(key)
        fan_in = in_channels * kh * kw
        bound = 1.0 / (fan_in ** 0.5)
        # weight: (Cout, Cin, KH, KW) — PyTorch convention
        self.weight = jax.random.uniform(
            k_w, (out_channels, in_channels, kh, kw),
            minval=-bound, maxval=bound, dtype=jnp.float32)
        self.bias = jax.random.uniform(
            k_b, (out_channels,), minval=-bound, maxval=bound,
            dtype=jnp.float32)

    def __call__(self, x):
        # x: (N, Cin, H, W)  (NCHW, matching PyTorch)
        N, Cin, H, W = x.shape
        if self.enforce_in_spatial_shape:
            if (H, W) != self.in_spatial_shape:
                raise ValueError(
                    "Expected input spatial shape {}, got {} instead".format(
                        self.in_spatial_shape, (H, W)))
        kh, kw = self.kernel_size
        sh, sw = self.stride
        dh, dw = self.dilation
        oh, ow = self.out_spatial_shape

        # --- glue: NCHW -> NHWC, TF-SAME zero pad ---
        x_nhwc = jnp.transpose(x, (0, 2, 3, 1))
        x_pad = jnp.pad(
            x_nhwc,
            ((0, 0),
             (self.pad_top, self.pad_bottom),
             (self.pad_left, self.pad_right),
             (0, 0)))

        # --- glue: im2col (static strided slices only) ---
        cols = []
        for ih_k in range(kh):
            for iw_k in range(kw):
                h0 = ih_k * dh
                w0 = iw_k * dw
                patch = x_pad[:, h0:h0 + (oh - 1) * sh + 1:sh,
                                 w0:w0 + (ow - 1) * sw + 1:sw, :]
                cols.append(patch)  # (N, OH, OW, Cin)
        # (N, OH, OW, KH*KW, Cin) -> (N*OH*OW, KH*KW*Cin)
        patches = jnp.stack(cols, axis=3).reshape(N * oh * ow, kh * kw * Cin)

        # weight (Cout, Cin, KH, KW) -> (KH, KW, Cin, Cout) -> (KH*KW*Cin, Cout)
        w_flat = jnp.transpose(self.weight, (2, 3, 1, 0)).reshape(
            kh * kw * Cin, self.out_channels)

        # --- hot path: tiled Pallas matmul + bias on the MXU ---
        out_flat = _pallas_conv_matmul(patches, w_flat, self.bias,
                                       out_dtype=x.dtype)

        # --- glue: back to NCHW ---
        out = out_flat.reshape(N, oh, ow, self.out_channels)
        out = jnp.transpose(out, (0, 3, 1, 2))
        return out


def _reference_conv(x, weight, bias, stride, dilation, pads):
    # pads = (top, bottom, left, right), matching nn.ZeroPad2d + Conv2d.
    top, bottom, left, right = pads
    x_pad = jnp.pad(x, ((0, 0), (0, 0), (top, bottom), (left, right)))
    out = jax.lax.conv_general_dilated(
        x_pad, weight,
        window_strides=stride,
        padding="VALID",
        rhs_dilation=dilation,
        dimension_numbers=("NCHW", "OIHW", "NCHW"))
    return out + bias.reshape(1, -1, 1, 1)


if __name__ == "__main__":
    key = jax.random.PRNGKey(0)
    k_x, k_p = jax.random.split(key)

    N, Cin, H, W = 2, 4, 16, 16
    Cout, K, S = 8, 3, 2

    x = jax.random.normal(k_x, (N, Cin, H, W), dtype=jnp.float32)

    mod = SamePaddingConv2d(
        in_spatial_shape=(H, W), in_channels=Cin, out_channels=Cout,
        kernel_size=K, stride=S, dilation=1, key=k_p)

    out = mod(x)
    out = jax.block_until_ready(out)

    # Sanity check against XLA reference conv (loose tolerance: kernel uses
    # bf16 operands with f32 accumulation).
    ref = _reference_conv(
        x, mod.weight, mod.bias, mod.stride, mod.dilation,
        (mod.pad_top, mod.pad_bottom, mod.pad_left, mod.pad_right))
    assert out.shape == (N, Cout) + mod.out_spatial_shape
    assert jnp.allclose(out, ref, atol=5e-2, rtol=5e-2), (
        float(jnp.max(jnp.abs(out - ref))))

    print("KERNEL_OK")
</pallas_src>

<mosaic_0001>
module attributes {stable_mosaic.version = 11 : i64} {
  func.func @_conv_matmul_kernel(%arg0: i32, %arg1: i32, %arg2: i32, %arg3: memref<128x128xbf16, #tpu.memory_space<vmem>>, %arg4: memref<128x128xbf16, #tpu.memory_space<vmem>>, %arg5: memref<1x128xf32, #tpu.memory_space<vmem>>, %arg6: memref<128x128xf32, #tpu.memory_space<vmem>>, %arg7: memref<128x128xf32, #tpu.memory_space<vmem>>) attributes {dimension_semantics = [#tpu.dimension_semantics<parallel>, #tpu.dimension_semantics<parallel>, #tpu.dimension_semantics<arbitrary>], iteration_bounds = array<i64: 1, 1, 1>, scalar_prefetch = 0 : i64, scratch_operands = 1 : i64, tpu.core_type = #tpu.core_type<tc>, window_params = [{transform_indices = @transform_0, window_bounds = array<i64: 128, 128>}, {transform_indices = @transform_1, window_bounds = array<i64: 128, 128>}, {transform_indices = @transform_2, window_bounds = array<i64: 1, 128>}, {transform_indices = @transform_3, window_bounds = array<i64: 128, 128>}]} {
    %c0_i32 = arith.constant 0 : i32
    %0 = arith.cmpi eq, %arg2, %c0_i32 : i32
    %1 = arith.extui %0 : i1 to i32
    %c0_i32_0 = arith.constant 0 : i32
    %2 = arith.cmpi ne, %1, %c0_i32_0 : i32
    scf.if %2 {
      %cst_10 = arith.constant 0.000000e+00 : f32
      %12 = vector.broadcast %cst_10 : f32 to vector<128x128xf32>
      %c0_11 = arith.constant 0 : index
      %c0_12 = arith.constant 0 : index
      %13 = vector.load %arg7[%c0_11, %c0_12] : memref<128x128xf32, #tpu.memory_space<vmem>>, vector<128x128xf32>
      tpu.vector_store %arg7[%c0_11, %c0_12], %12 {strides = array<i32>} : memref<128x128xf32, #tpu.memory_space<vmem>>, vector<128x128xf32>,
    } else {
    }
    %c0 = arith.constant 0 : index
    %c0_1 = arith.constant 0 : index
    %3 = vector.load %arg7[%c0, %c0_1] : memref<128x128xf32, #tpu.memory_space<vmem>>, vector<128x128xf32>
    %c0_2 = arith.constant 0 : index
    %c0_3 = arith.constant 0 : index
    %4 = vector.load %arg3[%c0_2, %c0_3] : memref<128x128xbf16, #tpu.memory_space<vmem>>, vector<128x128xbf16>
    %c0_4 = arith.constant 0 : index
    %c0_5 = arith.constant 0 : index
    %5 = vector.load %arg4[%c0_4, %c0_5] : memref<128x128xbf16, #tpu.memory_space<vmem>>, vector<128x128xbf16>
    %cst = arith.constant dense<0.000000e+00> : vector<128x128xf32>
    %6 = tpu.matmul %4, %5, %cst {dimension_numbers = #tpu.dot_dimension_numbers<[1], [0], [0], [1], [0, 0, 1, 1], [], []>} : vector<128x128xbf16>, vector<128x128xbf16>, vector<128x128xf32> -> vector<128x128xf32>
    %7 = arith.addf %3, %6 : vector<128x128xf32>
    %c0_6 = arith.constant 0 : index
    %c0_7 = arith.constant 0 : index
    %8 = vector.load %arg7[%c0_6, %c0_7] : memref<128x128xf32, #tpu.memory_space<vmem>>, vector<128x128xf32>
    tpu.vector_store %arg7[%c0_6, %c0_7], %7 {strides = array<i32>} : memref<128x128xf32, #tpu.memory_space<vmem>>, vector<128x128xf32>,
    %c0_i32_8 = arith.constant 0 : i32
    %9 = arith.cmpi eq, %arg2, %c0_i32_8 : i32
    %10 = arith.extui %9 : i1 to i32
    %c0_i32_9 = arith.constant 0 : i32
    %11 = arith.cmpi ne, %10, %c0_i32_9 : i32
    scf.if %11 {
      %c0_10 = arith.constant 0 : index
      %c0_11 = arith.constant 0 : index
      %12 = vector.load %arg7[%c0_10, %c0_11] : memref<128x128xf32, #tpu.memory_space<vmem>>, vector<128x128xf32>
      %c0_12 = arith.constant 0 : index
      %c0_13 = arith.constant 0 : index
      %13 = vector.load %arg5[%c0_12, %c0_13] : memref<1x128xf32, #tpu.memory_space<vmem>>, vector<1x128xf32>
      %14 = vector.broadcast %13 : vector<1x128xf32> to vector<128x128xf32>
      %15 = arith.addf %12, %14 : vector<128x128xf32>
      %c0_14 = arith.constant 0 : index
      %c0_15 = arith.constant 0 : index
      %16 = vector.load %arg6[%c0_14, %c0_15] : memref<128x128xf32, #tpu.memory_space<vmem>>, vector<128x128xf32>
      tpu.vector_store %arg6[%c0_14, %c0_15], %15 {strides = array<i32>} : memref<128x128xf32, #tpu.memory_space<vmem>>, vector<128x128xf32>,
    } else {
    }
    return
  }
  func.func @transform_0(%arg0: i32, %arg1: i32, %arg2: i32) -> (i32, i32) {
    %c0_i32 = arith.constant 0 : i32
    return %arg0, %arg2 : i32, i32
  }
  func.func @transform_1(%arg0: i32, %arg1: i32, %arg2: i32) -> (i32, i32) {
    %c0_i32 = arith.constant 0 : i32
    return %arg2, %arg1 : i32, i32
  }
  func.func @transform_2(%arg0: i32, %arg1: i32, %arg2: i32) -> (i32, i32) {
    %c0_i32 = arith.constant 0 : i32
    %c0_i32_0 = arith.constant 0 : i32
    return %c0_i32, %arg1 : i32, i32
  }
  func.func @transform_3(%arg0: i32, %arg1: i32, %arg2: i32) -> (i32, i32) {
    %c0_i32 = arith.constant 0 : i32
    return %arg0, %arg1 : i32, i32
  }
}

</mosaic_0001>

<bundles_post_ra>
// kernel: tpu_custom_call.1
= control target key start
LH: loop header
LB: loop body
LE: loop exit
PB: predicated region body
PF: predicated region fallthrough
CT: control target
= control target key end

     0   :  { %8 = vsyncpa [#allocation4], 0  ;;  %s655_s0 = inlined_call_operand.hbm [shape: bf16[128,128], index: 0, kind: input, shape index: {}]   ;;  %s656_s1 = inlined_call_operand.hbm [shape: bf16[128,128], index: 1, kind: input, shape index: {}]   ;;  %s657_s2 = inlined_call_operand.vmem [shape: f32[1,128], index: 2, kind: input, shape index: {}]   ;;  %s658_s3 = inlined_call_operand.hbm [shape: f32[128,128], index: 3, kind: output, shape index: {}]  }
   0x1   :  { %9 = vsyncpa [#allocation7], 0 }
   0x2   :  { %10 = vsyncpa [#allocation5], 0  ;;  %s589_s12 = smov [#allocation3]   ;;  %s517_s16 = scalar_lea.hbm %s655_s0, 1024 }
   0x3   :  { %s16_s13 = sshll.u32 %s589_s12, 4  ;;  %p518_p0 = scmp.ne.s32.totalorder %s655_s0, %s517_s16  ;;  %s17_s13 = int_to_ptr.vmem [resolvable:$true] %s16_s13 }
   0x4   :  { %p521_p1 = scmp.lt.u32.totalorder %s517_s16, %s655_s0 }
   0x6   :  { %p523_p2 = pnand %p521_p1, %p518_p0 }
   0x8   :  { %526 = shalt.err (!%p523_p2)
}
   0x9   :  { %s527_s21 = scalar_lea.vmem %s17_s13, 1024  ;;  %p532_p4 = scmp.lt.s32.totalorder %s17_s13, %s17_s13 }
   0xa   :  { %p528_p3 = scmp.ne.s32.totalorder %s17_s13, %s527_s21  ;;  %p533_p5 = scmp.lt.s32.totalorder %s527_s21, %s527_s21 }
   0xc   :  { %p534_p6 = por %p533_p5, %p532_p4 }
   0xe   :  { %p535_p7 = pnand %p534_p6, %p528_p3 }
  0x10   :  { %538 = shalt.err (!%p535_p7)
}
  0x11   :  { %s590_s22 = smov 64   ;;  %s591_s23 = smov 4  }
  0x12   :  { %22 = dma.hbm_to_vmem [thread:$0]  %s655_s0, 1024, %s17_s13, [#allocation4], %s590_s22, %s590_s22, %s591_s23  }
  0x13   :  { %s592_s26 = smov [#allocation6]   ;;  %s539_s30 = scalar_lea.hbm %s656_s1, 1024 }
  0x14   :  { %s28_s27 = sshll.u32 %s592_s26, 4  ;;  %p540_p8 = scmp.ne.s32.totalorder %s656_s1, %s539_s30  ;;  %s29_s27 = int_to_ptr.vmem [resolvable:$true] %s28_s27 }
  0x15   :  { %p543_p9 = scmp.lt.u32.totalorder %s539_s30, %s656_s1 }
  0x17   :  { %p545_p10 = pnand %p543_p9, %p540_p8 }
  0x19   :  { %548 = shalt.err (!%p545_p10)
}
  0x1a   :  { %s549_s8 = scalar_lea.vmem %s29_s27, 1024  ;;  %p554_p12 = scmp.lt.s32.totalorder %s29_s27, %s29_s27 }
  0x1b   :  { %p550_p11 = scmp.ne.s32.totalorder %s29_s27, %s549_s8  ;;  %p555_p13 = scmp.lt.s32.totalorder %s549_s8, %s549_s8 }
  0x1d   :  { %p556_p0 = por %p555_p13, %p554_p12 }
  0x1f   :  { %p557_p1 = pnand %p556_p0, %p550_p11 }
  0x21   :  { %560 = shalt.err (!%p557_p1)
}
  0x22   :  { %34 = dma.hbm_to_vmem [thread:$0]  %s656_s1, 1024, %s29_s27, [#allocation7], %s590_s22, %s590_s22, %s591_s23  }
  0x23   :  { %583 = dma.done.wait [#allocation4], 1024  }
  0x24   :  { %584 = vsyncadd [#allocation4], 4294966272 }
  0x25   :  { %585 = dma.done.wait [#allocation7], 1024  }
  0x26   :  { %586 = vsyncadd [#allocation7], 4294966272  ;;  %v501_v0 = vld [vmem:[#allocation6] sm:$0xff]   ;;  %v502_v1 = vld [vmem:[#allocation6 + $0x8] sm:$0xff]  }
  0x27   :  { %446 = vmatprep.subr.bf16.mxu0 %v501_v0  ;;  %478 = vmatprep.subr.bf16.mxu1 %v501_v0  ;;  %v503_v2 = vld [vmem:[#allocation6 + $0x10] sm:$0xff]   ;;  %v504_v3 = vld [vmem:[#allocation6 + $0x18] sm:$0xff]   ;;  %v509_v4 = vld [vmem:[#allocation3] sm:$0xff]  }
  0x28   :  { %447 = vmatpush3.bf16.msra.mxu0 %v501_v0  ;;  %486 = vmatpush3.bf16.msra.mxu1 %v501_v0  ;;  %v510_v5 = vld [vmem:[#allocation3 + $0x20] sm:$0xff]   ;;  %v506_v7 = vld [vmem:[#allocation6 + $0x28] sm:$0xff]   ;;  %v507_v8 = vld [vmem:[#allocation6 + $0x30] sm:$0xff]  }
  0x29   :  { %448 = vmatprep.subr.bf16.mxu0 %v502_v1  ;;  %479 = vmatprep.subr.bf16.mxu1 %v502_v1  ;;  %v505_v6 = vld [vmem:[#allocation6 + $0x20] sm:$0xff]   ;;  %v508_v9 = vld [vmem:[#allocation6 + $0x38] sm:$0xff]   ;;  %v511_v10 = vld [vmem:[#allocation3 + $0x8] sm:$0xff]  }
  0x2a   :  { %462 = vmatprep.mubr.bf16.mxu0 %v509_v4  ;;  %470 = vmatprep.mubr.bf16.mxu1 %v510_v5  ;;  %v512_v11 = vld [vmem:[#allocation3 + $0x28] sm:$0xff]   ;;  %v513_v12 = vld [vmem:[#allocation3 + $0x10] sm:$0xff]   ;;  %v515_v14 = vld [vmem:[#allocation3 + $0x18] sm:$0xff]  }
  0x2b   :  { %v514_v13 = vld [vmem:[#allocation3 + $0x30] sm:$0xff]   ;;  %v516_v15 = vld [vmem:[#allocation3 + $0x38] sm:$0xff]   ;;  %v429_v16 = vld [vmem:[%s657_s2] ss:$0 sm:$0xff]  ;;  %s593_s2 = smov [#allocation8]  }
  0x2c   :  { %449 = vmatpush3.bf16.msra.mxu0 %v502_v1  ;;  %487 = vmatpush3.bf16.msra.mxu1 %v502_v1  ;;  %s400_s11 = sshll.u32 %s593_s2, 4  ;;  %s401_s11 = int_to_ptr.vmem [resolvable:$true] %s400_s11 }
  0x2d   :  { %450 = vmatprep.subr.bf16.mxu0 %v503_v2  ;;  %480 = vmatprep.subr.bf16.mxu1 %v503_v2  ;;  %s561_s12 = scalar_lea.vmem %s401_s11, 2048  ;;  %p566_p3 = scmp.lt.s32.totalorder %s401_s11, %s401_s11 }
  0x2e   :  { %p562_p2 = scmp.ne.s32.totalorder %s401_s11, %s561_s12  ;;  %p567_p4 = scmp.lt.s32.totalorder %s561_s12, %s561_s12 }
  0x30   :  { %451 = vmatpush3.bf16.msra.mxu0 %v503_v2  ;;  %488 = vmatpush3.bf16.msra.mxu1 %v503_v2  ;;  %p568_p5 = por %p567_p4, %p566_p3 }
  0x31   :  { %452 = vmatprep.subr.bf16.mxu0 %v504_v3  ;;  %481 = vmatprep.subr.bf16.mxu1 %v504_v3 }
  0x32   :  { %p569_p6 = pnand %p568_p5, %p562_p2 }
  0x34   :  { %453 = vmatpush3.bf16.msra.mxu0 %v504_v3  ;;  %489 = vmatpush3.bf16.msra.mxu1 %v504_v3 }
  0x35   :  { %454 = vmatprep.subr.bf16.mxu0 %v505_v6  ;;  %482 = vmatprep.subr.bf16.mxu1 %v505_v6 }
  0x38   :  { %455 = vmatpush3.bf16.msra.mxu0 %v505_v6  ;;  %490 = vmatpush3.bf16.msra.mxu1 %v505_v6 }
  0x39   :  { %456 = vmatprep.subr.bf16.mxu0 %v506_v7  ;;  %483 = vmatprep.subr.bf16.mxu1 %v506_v7 }
  0x3c   :  { %457 = vmatpush3.bf16.msra.mxu0 %v506_v7  ;;  %491 = vmatpush3.bf16.msra.mxu1 %v506_v7 }
  0x3d   :  { %458 = vmatprep.subr.bf16.mxu0 %v507_v8  ;;  %484 = vmatprep.subr.bf16.mxu1 %v507_v8 }
  0x40   :  { %459 = vmatpush3.bf16.msra.mxu0 %v507_v8  ;;  %492 = vmatpush3.bf16.msra.mxu1 %v507_v8 }
  0x41   :  { %460 = vmatprep.subr.bf16.mxu0 %v508_v9  ;;  %485 = vmatprep.subr.bf16.mxu1 %v508_v9 }
  0x44   :  { %461 = vmatpush3.bf16.msra.mxu0 %v508_v9  ;;  %493 = vmatpush3.bf16.msra.mxu1 %v508_v9 }
  0x47   :  { %463 = vmatmul.mubr.bf16.vlgmr.msra.gmra.mrb[0].mxu0 %v511_v10  ;;  %471 = vmatmul.mubr.bf16.vlgmr.msra.gmra.mrb[0].mxu1 %v512_v11 }
  0x48   :  { %466 = vmatprep.mubr.bf16.mxu0 %v513_v12  ;;  %474 = vmatprep.mubr.bf16.mxu1 %v514_v13 }
  0x4f   :  { %467 = vmatmul.mubr.bf16.gmra.mrb[4].mxu0 %v515_v14  ;;  %475 = vmatmul.mubr.bf16.gmra.mrb[4].mxu1 %v516_v15 }
 0x11a   :  { %v464_v17 = vpop.f32.mrb[0].mxu0  ;;  %v472_v18 = vpop.f32.mrb[0].mxu1 }
 0x11b   :  { %v365_v19 = vadd.f32 %v464_v17, %v429_v16  ;;  %v373_v20 = vadd.f32 %v472_v18, %v429_v16  ;;  %v242_v21 = vpop.f32.mrb[1].mxu0  ;;  %v274_v22 = vpop.f32.mrb[1].mxu1 }
 0x11c   :  { %v363_v23 = vadd.f32 %v429_v16, %v242_v21  ;;  %v371_v24 = vadd.f32 %v429_v16, %v274_v22  ;;  %v465_v25 = vpop.f32.mrb[2].mxu0  ;;  %v473_v26 = vpop.f32.mrb[2].mxu1 }
 0x11d   :  { %381 = vst [vmem:[#allocation8 + $0x10] sm:$0xff] %v365_v19  ;;  %389 = vst [vmem:[#allocation8 + $0x50] sm:$0xff] %v373_v20  ;;  %v366_v27 = vadd.f32 %v465_v25, %v429_v16  ;;  %v374_v28 = vadd.f32 %v473_v26, %v429_v16  ;;  %v245_v29 = vpop.f32.mrb[3].mxu0  ;;  %v277_v30 = vpop.f32.mrb[3].mxu1 }
 0x11e   :  { %379 = vst [vmem:[#allocation8] sm:$0xff] %v363_v23  ;;  %387 = vst [vmem:[#allocation8 + $0x40] sm:$0xff] %v371_v24  ;;  %v364_v31 = vadd.f32 %v429_v16, %v245_v29  ;;  %v372_v32 = vadd.f32 %v429_v16, %v277_v30 }
 0x11f   :  { %382 = vst [vmem:[#allocation8 + $0x18] sm:$0xff] %v366_v27  ;;  %390 = vst [vmem:[#allocation8 + $0x58] sm:$0xff] %v374_v28 }
 0x120   :  { %380 = vst [vmem:[#allocation8 + $0x8] sm:$0xff] %v364_v31  ;;  %388 = vst [vmem:[#allocation8 + $0x48] sm:$0xff] %v372_v32 }
 0x122   :  { %v468_v33 = vpop.f32.mrb[4].mxu0  ;;  %v476_v34 = vpop.f32.mrb[4].mxu1 }
 0x123   :  { %v369_v35 = vadd.f32 %v468_v33, %v429_v16  ;;  %v377_v36 = vadd.f32 %v476_v34, %v429_v16  ;;  %v258_v37 = vpop.f32.mrb[5].mxu0  ;;  %v290_v38 = vpop.f32.mrb[5].mxu1 }
 0x124   :  { %v367_v39 = vadd.f32 %v429_v16, %v258_v37  ;;  %v375_v40 = vadd.f32 %v429_v16, %v290_v38  ;;  %v469_v41 = vpop.f32.mrb[6].mxu0  ;;  %v477_v42 = vpop.f32.mrb[6].mxu1 }
 0x125   :  { %385 = vst [vmem:[#allocation8 + $0x30] sm:$0xff] %v369_v35  ;;  %393 = vst [vmem:[#allocation8 + $0x70] sm:$0xff] %v377_v36  ;;  %v370_v43 = vadd.f32 %v469_v41, %v429_v16  ;;  %v378_v44 = vadd.f32 %v477_v42, %v429_v16  ;;  %v261_v45 = vpop.f32.mrb[7].mxu0  ;;  %v293_v46 = vpop.f32.mrb[7].mxu1 }
 0x126   :  { %383 = vst [vmem:[#allocation8 + $0x20] sm:$0xff] %v367_v39  ;;  %391 = vst [vmem:[#allocation8 + $0x60] sm:$0xff] %v375_v40  ;;  %v368_v47 = vadd.f32 %v429_v16, %v261_v45  ;;  %v376_v48 = vadd.f32 %v429_v16, %v293_v46 }
 0x127   :  { %386 = vst [vmem:[#allocation8 + $0x38] sm:$0xff] %v370_v43  ;;  %394 = vst [vmem:[#allocation8 + $0x78] sm:$0xff] %v378_v44 }
 0x128   :  { %384 = vst [vmem:[#allocation8 + $0x28] sm:$0xff] %v368_v47  ;;  %392 = vst [vmem:[#allocation8 + $0x68] sm:$0xff] %v376_v48 }
 0x129   :  { %572 = shalt.err (!%p569_p6)
}
 0x12a   :  { %s573_s15 = scalar_lea.hbm %s658_s3, 2048 }
 0x12b   :  { %p574_p7 = scmp.ne.s32.totalorder %s658_s3, %s573_s15  ;;  %p577_p8 = scmp.lt.u32.totalorder %s573_s15, %s658_s3 }
 0x12d   :  { %p579_p9 = pnand %p577_p8, %p574_p7 }
 0x12f   :  { %582 = shalt.err (!%p579_p9)
}
 0x130   :  { %s594_s20 = smov 128   ;;  %s595_s21 = smov 8  }
 0x131   :  { %406 = dma.vmem_to_hbm [thread:$0]  %s401_s11, 2048, %s658_s3, [#allocation5], %s594_s20, %s594_s20, %s595_s21  }
 0x132   :  { %587 = dma.done.wait [#allocation5], 2048  }
 0x133   :  { %588 = vsyncadd [#allocation5], 4294965248 }
 0x134   :  { %410 = vsyncpa [#allocation4], 1 }
 0x135   :  { %411 = vsyncpa [#allocation7], 1 }
 0x136   :  { %412 = vsyncpa [#allocation5], 1 }

</bundles_post_ra>
